<compile_context>
chip_gen: v5e
topology: v5e:2x2
jax: 0.10.0
libtpu: 0.0.40
codegen_flags: <defaults>
</compile_context>

<pallas_src>
import numpy as np
import jax
import jax.numpy as jnp
from jax.experimental import pallas as pl
from jax.experimental.pallas import tpu as pltpu


def _round_up(n, m):
    return ((n + m - 1) // m) * m


# ----------------------------- Pallas kernel ------------------------------ #
def policy_net_kernel(x_ref, w1_ref, b1_ref, w2_ref, b2_ref, w3_ref, b3_ref,
                      out_ref):
    # Cast obs tile to bf16 in-register (free on the VPU) for the MXU.
    x = x_ref[...].astype(jnp.bfloat16)

    # Layer 1: Linear (bf16 MXU, f32 accumulate) + tanh (f32, EUP)
    h1 = jnp.tanh(
        jnp.dot(x, w1_ref[...], preferred_element_type=jnp.float32)
        + b1_ref[...])

    # Layer 2: Linear + tanh
    h2 = jnp.tanh(
        jnp.dot(h1.astype(jnp.bfloat16), w2_ref[...],
                preferred_element_type=jnp.float32)
        + b2_ref[...])

    # Layer 3: Linear -> (tile_b, out_dim) logits, numerically-stable softmax.
    logits = (jnp.dot(h2.astype(jnp.bfloat16), w3_ref[...],
                      preferred_element_type=jnp.float32)
              + b3_ref[...])
    m = jnp.max(logits, axis=-1, keepdims=True)
    e = jnp.exp(logits - m)
    denom = jnp.sum(e, axis=-1, keepdims=True)
    # Exact divide (plenty of EUP/VALU slack) so rows sum to 1 to f32 precision
    # and downstream log(probs) in the PPO loss is unbiased.
    out_ref[...] = e / denom


# ------------------------------ host wrapper ------------------------------- #
def policy_net_forward(x, w1, b1, w2, b2, w3, b3, *, tile_b=2048):
    """Full MLP forward.  x: (B, in_dim) f32.  Returns (B, out_dim) f32 probs."""
    B, in_dim = x.shape
    hidden = w1.shape[1]
    out_dim = w3.shape[1]

    # No-op if params were already prepared (bf16) via prepare_policy_params.
    w1 = w1 if w1.dtype == jnp.bfloat16 else w1.astype(jnp.bfloat16)
    w2 = w2 if w2.dtype == jnp.bfloat16 else w2.astype(jnp.bfloat16)
    w3 = w3 if w3.dtype == jnp.bfloat16 else w3.astype(jnp.bfloat16)

    # --- batch tiling ---
    # Multiple of 16 (bf16-friendly sublane packing), big enough to amortize
    # per-grid-step overhead, but keep >= 2 grid steps when the batch allows
    # so both TensorCores are used on megacore parts (v7x).
    tile_b = max(16, (min(int(tile_b), 4096) // 16) * 16)
    if B < 2 * tile_b:
        tile_b = min(tile_b, max(16, _round_up(pl.cdiv(B, 2), 16)))
    tile_b = min(tile_b, max(8, _round_up(B, 8)))  # never larger than needed
    grid = (pl.cdiv(B, tile_b),)  # ragged final block handled by masking

    # Advisory cost estimate so XLA schedules this call sensibly inside a
    # larger rollout jit.
    param_elems = in_dim * hidden + hidden * hidden + hidden * out_dim
    cost = pl.CostEstimate(
        flops=2 * B * param_elems,
        transcendentals=B * (2 * hidden + out_dim),
        bytes_accessed=(B * in_dim * 4 + B * out_dim * 4
                        + param_elems * 2 + (2 * hidden + out_dim) * 4),
    )

    probs = pl.pallas_call(
        policy_net_kernel,
        out_shape=jax.ShapeDtypeStruct((B, out_dim), jnp.float32),
        grid_spec=pltpu.PrefetchScalarGridSpec(
            num_scalar_prefetch=0,
            grid=grid,
            in_specs=[
                # streamed activations: one batch tile per grid step
                pl.BlockSpec((tile_b, in_dim), lambda i: (i, 0)),
                # parameters: constant index_map -> DMA'd once, stay resident
                pl.BlockSpec((in_dim, hidden), lambda i: (0, 0)),
                pl.BlockSpec((1, hidden), lambda i: (0, 0)),
                pl.BlockSpec((hidden, hidden), lambda i: (0, 0)),
                pl.BlockSpec((1, hidden), lambda i: (0, 0)),
                pl.BlockSpec((hidden, out_dim), lambda i: (0, 0)),
                pl.BlockSpec((1, out_dim), lambda i: (0, 0)),
            ],
            # Narrow output: last dim == full array dim (legal), cheap masked
            # stores, no padded writeback, no wrapper slice afterwards.
            out_specs=pl.BlockSpec((tile_b, out_dim), lambda i: (i, 0)),
        ),
        compiler_params=pltpu.CompilerParams(
            dimension_semantics=("parallel",)),
        cost_estimate=cost,
    )(x, w1, b1, w2, b2, w3, b3)

    return probs


# --------------------------- parameter creation ---------------------------- #
def orthogonal_init(key, shape, std):
    """Orthogonal init in the spirit of torch.nn.init.orthogonal_.

    `shape` is (fan_out, fan_in) like a PyTorch Linear weight; returns the
    transposed (fan_in, fan_out) matrix for the x @ W convention.
    """
    rows, cols = shape
    a = jax.random.normal(key, (max(rows, cols), min(rows, cols)),
                          dtype=jnp.float32)
    q, r = jnp.linalg.qr(a)
    q = q * jnp.sign(jnp.diag(r))
    if rows < cols:
        q = q.T
    w = std * q[:rows, :cols]              # (fan_out, fan_in)
    return w.T                             # (fan_in, fan_out)


def make_policy_params(key, in_dim, out_dim, hidden=64):
    k1, k2, k3 = jax.random.split(key, 3)
    w1 = orthogonal_init(k1, (hidden, in_dim), std=np.sqrt(2))
    w2 = orthogonal_init(k2, (hidden, hidden), std=np.sqrt(2))
    w3 = orthogonal_init(k3, (out_dim, hidden), std=0.01)
    b1 = jnp.zeros((1, hidden), jnp.float32)
    b2 = jnp.zeros((1, hidden), jnp.float32)
    b3 = jnp.zeros((1, out_dim), jnp.float32)
    return w1, b1, w2, b2, w3, b3


def prepare_policy_params(w1, b1, w2, b2, w3, b3):
    """One-time conversion to the kernel-ready layout (bf16 MXU weights,
    f32 biases).  Call once outside the rollout loop, not per forward."""
    return (w1.astype(jnp.bfloat16), b1,
            w2.astype(jnp.bfloat16), b2,
            w3.astype(jnp.bfloat16), b3)


# --------------------------------- main ------------------------------------ #
if __name__ == "__main__":
    key = jax.random.PRNGKey(0)
    k_obs, k_params = jax.random.split(key)

    # Small demo shapes; B=50 deliberately not a multiple of the tile so the
    # masked final block path is exercised (no jnp.pad in the wrapper).
    B, in_dim, out_dim = 50, 16, 4
    obs = jax.random.normal(k_obs, (B, in_dim), dtype=jnp.float32)

    params_f32 = make_policy_params(k_params, in_dim, out_dim)
    params = prepare_policy_params(*params_f32)   # bf16 weights, done once

    probs = policy_net_forward(obs, *params)
    probs = jax.block_until_ready(probs)
    assert probs.shape == (B, out_dim)

    # exact normalization -> rows sum to 1 within f32 rounding
    assert np.allclose(np.asarray(jnp.sum(probs, axis=-1)), 1.0, atol=1e-5)

    w1f, b1, w2f, b2, w3f, b3 = params_f32
    w1b, _, w2b, _, w3b, _ = params

    # reference matching kernel numerics (bf16 MXU operands, f32 accumulate)
    xb = obs.astype(jnp.bfloat16)
    h1 = jnp.tanh(jnp.dot(xb, w1b, preferred_element_type=jnp.float32) + b1)
    h2 = jnp.tanh(jnp.dot(h1.astype(jnp.bfloat16), w2b,
                          preferred_element_type=jnp.float32) + b2)
    ref_bf16 = jax.nn.softmax(
        jnp.dot(h2.astype(jnp.bfloat16), w3b,
                preferred_element_type=jnp.float32) + b3, axis=-1)
    assert np.allclose(np.asarray(probs), np.asarray(ref_bf16), atol=5e-3)

    # pure-f32 reference (semantic sanity vs PyTorch; loose tol for bf16 MXU)
    hf = jnp.tanh(obs @ w1f + b1)
    hf = jnp.tanh(hf @ w2f + b2)
    ref_f32 = jax.nn.softmax(hf @ w3f + b3, axis=-1)
    assert np.allclose(np.asarray(probs), np.asarray(ref_f32), atol=3e-2)

    print("KERNEL_OK")
</pallas_src>

<mosaic_0001>
module attributes {stable_mosaic.version = 11 : i64} {
  func.func @policy_net_kernel(%arg0: i32, %arg1: memref<32x16xf32, #tpu.memory_space<vmem>>, %arg2: memref<16x64xbf16, #tpu.memory_space<vmem>>, %arg3: memref<1x64xf32, #tpu.memory_space<vmem>>, %arg4: memref<64x64xbf16, #tpu.memory_space<vmem>>, %arg5: memref<1x64xf32, #tpu.memory_space<vmem>>, %arg6: memref<64x4xbf16, #tpu.memory_space<vmem>>, %arg7: memref<1x4xf32, #tpu.memory_space<vmem>>, %arg8: memref<32x4xf32, #tpu.memory_space<vmem>>) attributes {dimension_semantics = [#tpu.dimension_semantics<parallel>], iteration_bounds = array<i64: 2>, scalar_prefetch = 0 : i64, scratch_operands = 0 : i64, tpu.core_type = #tpu.core_type<tc>, window_params = [{transform_indices = @transform_0, window_bounds = array<i64: 32, 16>}, {pipeline_mode = #tpu.pipeline_mode<synchronous>, transform_indices = @transform_1, window_bounds = array<i64: 16, 64>}, {pipeline_mode = #tpu.pipeline_mode<synchronous>, transform_indices = @transform_2, window_bounds = array<i64: 1, 64>}, {pipeline_mode = #tpu.pipeline_mode<synchronous>, transform_indices = @transform_3, window_bounds = array<i64: 64, 64>}, {pipeline_mode = #tpu.pipeline_mode<synchronous>, transform_indices = @transform_4, window_bounds = array<i64: 1, 64>}, {pipeline_mode = #tpu.pipeline_mode<synchronous>, transform_indices = @transform_5, window_bounds = array<i64: 64, 4>}, {pipeline_mode = #tpu.pipeline_mode<synchronous>, transform_indices = @transform_6, window_bounds = array<i64: 1, 4>}, {transform_indices = @transform_7, window_bounds = array<i64: 32, 4>}]} {
    %c0 = arith.constant 0 : index
    %c0_0 = arith.constant 0 : index
    %0 = vector.load %arg1[%c0, %c0_0] : memref<32x16xf32, #tpu.memory_space<vmem>>, vector<32x16xf32>
    %1 = arith.truncf %0 : vector<32x16xf32> to vector<32x16xbf16>
    %c0_1 = arith.constant 0 : index
    %c0_2 = arith.constant 0 : index
    %2 = vector.load %arg2[%c0_1, %c0_2] : memref<16x64xbf16, #tpu.memory_space<vmem>>, vector<16x64xbf16>
    %cst = arith.constant dense<0.000000e+00> : vector<32x64xf32>
    %3 = tpu.matmul %1, %2, %cst {dimension_numbers = #tpu.dot_dimension_numbers<[1], [0], [0], [1], [0, 0, 1, 1], [], []>} : vector<32x16xbf16>, vector<16x64xbf16>, vector<32x64xf32> -> vector<32x64xf32>
    %c0_3 = arith.constant 0 : index
    %c0_4 = arith.constant 0 : index
    %4 = vector.load %arg3[%c0_3, %c0_4] : memref<1x64xf32, #tpu.memory_space<vmem>>, vector<1x64xf32>
    %5 = vector.broadcast %4 : vector<1x64xf32> to vector<32x64xf32>
    %6 = arith.addf %3, %5 : vector<32x64xf32>
    %7 = math.tanh %6 : vector<32x64xf32>
    %8 = arith.truncf %7 : vector<32x64xf32> to vector<32x64xbf16>
    %c0_5 = arith.constant 0 : index
    %c0_6 = arith.constant 0 : index
    %9 = vector.load %arg4[%c0_5, %c0_6] : memref<64x64xbf16, #tpu.memory_space<vmem>>, vector<64x64xbf16>
    %cst_7 = arith.constant dense<0.000000e+00> : vector<32x64xf32>
    %10 = tpu.matmul %8, %9, %cst_7 {dimension_numbers = #tpu.dot_dimension_numbers<[1], [0], [0], [1], [0, 0, 1, 1], [], []>} : vector<32x64xbf16>, vector<64x64xbf16>, vector<32x64xf32> -> vector<32x64xf32>
    %c0_8 = arith.constant 0 : index
    %c0_9 = arith.constant 0 : index
    %11 = vector.load %arg5[%c0_8, %c0_9] : memref<1x64xf32, #tpu.memory_space<vmem>>, vector<1x64xf32>
    %12 = vector.broadcast %11 : vector<1x64xf32> to vector<32x64xf32>
    %13 = arith.addf %10, %12 : vector<32x64xf32>
    %14 = math.tanh %13 : vector<32x64xf32>
    %15 = arith.truncf %14 : vector<32x64xf32> to vector<32x64xbf16>
    %c0_10 = arith.constant 0 : index
    %c0_11 = arith.constant 0 : index
    %16 = vector.load %arg6[%c0_10, %c0_11] : memref<64x4xbf16, #tpu.memory_space<vmem>>, vector<64x4xbf16>
    %cst_12 = arith.constant dense<0.000000e+00> : vector<32x4xf32>
    %17 = tpu.matmul %15, %16, %cst_12 {dimension_numbers = #tpu.dot_dimension_numbers<[1], [0], [0], [1], [0, 0, 1, 1], [], []>} : vector<32x64xbf16>, vector<64x4xbf16>, vector<32x4xf32> -> vector<32x4xf32>
    %c0_13 = arith.constant 0 : index
    %c0_14 = arith.constant 0 : index
    %18 = vector.load %arg7[%c0_13, %c0_14] : memref<1x4xf32, #tpu.memory_space<vmem>>, vector<1x4xf32>
    %19 = vector.broadcast %18 : vector<1x4xf32> to vector<32x4xf32>
    %20 = arith.addf %17, %19 : vector<32x4xf32>
    %cst_15 = arith.constant dense<0xFF800000> : vector<32xf32>
    %21 = vector.multi_reduction <maximumf>, %20, %cst_15 [1] : vector<32x4xf32> to vector<32xf32>
    %22 = vector.shape_cast %21 : vector<32xf32> to vector<32x1xf32>
    %23 = vector.broadcast %22 : vector<32x1xf32> to vector<32x4xf32>
    %24 = arith.subf %20, %23 : vector<32x4xf32>
    %25 = math.exp %24 : vector<32x4xf32>
    %cst_16 = arith.constant dense<0.000000e+00> : vector<32xf32>
    %26 = vector.multi_reduction <add>, %25, %cst_16 [1] : vector<32x4xf32> to vector<32xf32>
    %27 = vector.shape_cast %26 : vector<32xf32> to vector<32x1xf32>
    %28 = vector.broadcast %27 : vector<32x1xf32> to vector<32x4xf32>
    %29 = arith.divf %25, %28 : vector<32x4xf32>
    %c0_17 = arith.constant 0 : index
    %c0_18 = arith.constant 0 : index
    %30 = vector.load %arg8[%c0_17, %c0_18] : memref<32x4xf32, #tpu.memory_space<vmem>>, vector<32x4xf32>
    tpu.vector_store %arg8[%c0_17, %c0_18], %29 {strides = array<i32>} : memref<32x4xf32, #tpu.memory_space<vmem>>, vector<32x4xf32>,
    return
  }
  func.func @transform_0(%arg0: i32) -> (i32, i32) {
    %c0_i32 = arith.constant 0 : i32
    %c0_i32_0 = arith.constant 0 : i32
    return %arg0, %c0_i32 : i32, i32
  }
  func.func @transform_1(%arg0: i32) -> (i32, i32) {
    %c0_i32 = arith.constant 0 : i32
    %c0_i32_0 = arith.constant 0 : i32
    %c0_i32_1 = arith.constant 0 : i32
    return %c0_i32, %c0_i32_0 : i32, i32
  }
  func.func @transform_2(%arg0: i32) -> (i32, i32) {
    %c0_i32 = arith.constant 0 : i32
    %c0_i32_0 = arith.constant 0 : i32
    %c0_i32_1 = arith.constant 0 : i32
    return %c0_i32, %c0_i32_0 : i32, i32
  }
  func.func @transform_3(%arg0: i32) -> (i32, i32) {
    %c0_i32 = arith.constant 0 : i32
    %c0_i32_0 = arith.constant 0 : i32
    %c0_i32_1 = arith.constant 0 : i32
    return %c0_i32, %c0_i32_0 : i32, i32
  }
  func.func @transform_4(%arg0: i32) -> (i32, i32) {
    %c0_i32 = arith.constant 0 : i32
    %c0_i32_0 = arith.constant 0 : i32
    %c0_i32_1 = arith.constant 0 : i32
    return %c0_i32, %c0_i32_0 : i32, i32
  }
  func.func @transform_5(%arg0: i32) -> (i32, i32) {
    %c0_i32 = arith.constant 0 : i32
    %c0_i32_0 = arith.constant 0 : i32
    %c0_i32_1 = arith.constant 0 : i32
    return %c0_i32, %c0_i32_0 : i32, i32
  }
  func.func @transform_6(%arg0: i32) -> (i32, i32) {
    %c0_i32 = arith.constant 0 : i32
    %c0_i32_0 = arith.constant 0 : i32
    %c0_i32_1 = arith.constant 0 : i32
    return %c0_i32, %c0_i32_0 : i32, i32
  }
  func.func @transform_7(%arg0: i32) -> (i32, i32) {
    %c0_i32 = arith.constant 0 : i32
    %c0_i32_0 = arith.constant 0 : i32
    return %arg0, %c0_i32 : i32, i32
  }
}

</mosaic_0001>

<bundles_post_ra>
// kernel: tpu_custom_call.1
= control target key start
LH: loop header
LB: loop body
LE: loop exit
PB: predicated region body
PF: predicated region fallthrough
CT: control target
= control target key end

     0   :  { %s1142_s24 = smov 0   ;;  %s1144_s25 = smov 0   ;;  %s1302_s0 = inlined_call_operand.vmem [shape: f32[50,16], index: 0, kind: input, shape index: {}]   ;;  %s1303_s1 = inlined_call_operand.vmem [shape: bf16[16,64], index: 1, kind: input, shape index: {}]   ;;  %s1304_s2 = inlined_call_operand.vmem [shape: f32[1,64], index: 2, kind: input, shape index: {}]   ;;  %s1305_s3 = inlined_call_operand.vmem [shape: bf16[64,64], index: 3, kind: input, shape index: {}]   ;;  %s1306_s4 = inlined_call_operand.vmem [shape: f32[1,64], index: 4, kind: input, shape index: {}]   ;;  %s1307_s5 = inlined_call_operand.vmem [shape: bf16[64,4], index: 5, kind: input, shape index: {}]   ;;  %s1308_s6 = inlined_call_operand.vmem [shape: f32[1,4], index: 6, kind: input, shape index: {}]   ;;  %s1309_s7 = inlined_call_operand.vmem [shape: f32[50,4], index: 7, kind: output, shape index: {}]  }
   0x1   :  { %s1146_s26 = smov 0  }
   0x2 LB: > { %s1155_s27 = sadd.s32 4294967295, %s1068_s26   ;;  %s1157_s28 = sadd.s32 1, %s1068_s26   ;;  %s1068_s26 = sphi %s1146_s26, %s1316_s26   ;;  %s1064_s25 = sphi %s1144_s25, %s1315_s25   ;;  %s1060_s24 = sphi %s1142_s24, %s1314_s24  }
   0x3   : > { %s173_s29 = ssub.s32 %s1068_s26, %s1157_s28  ;;  %s176_s30 = sadd.s32 1, %s1064_s25 }
   0x4   : > { %p174_p0 = scmp.eq.s32.totalorder %s173_s29, 0  ;;  %p186_p1 = scmp.ne.s32.totalorder %s1064_s25, %s1060_s24 }
   0x5   : > { %p187_p2 = scmp.eq.s32.totalorder %s1155_s27, 1  ;;  %p812_p3 = scmp.ge.s32.totalorder %s1068_s26, 1 }
   0x6   : > { %s1165_s8 = scalar_select %p174_p0, %s1064_s25, %s176_s30  }
   0x7   : > { %p1167_p4 = por %p187_p2, %p186_p1  ;;  %p246_p5 = scmp.lt.s32.totalorder %s1068_s26, 3 }
   0x9   : > { %p247_p6 = pnand %p812_p3, %p246_p5 }
   0xa   : > { %s1175_s12 = sshll.u32 (!%p247_p6), %s1155_s27, 2  ;;  %s278_s26 = sand.u32 (!%p247_p6), 1, %s1060_s24  }
   0xb   : > { %250 = sbr.rel (%p247_p6) target bundleno = 781 (0x30d), region = 48  ;;  %p286_p7 = scmp.lt.s32.totalorder (!%p247_p6), %s1175_s12, 6 }
   0xc   : > { %s813_s29 = sshll.u32 (!%p247_p6), %s278_s26, 5 }
   0xd   : > { %s1234_s30 = scalar_lea.vmem (!%p247_p6), [#allocation2], %s813_s29  }
  0x10   : > { %v875_v0 = vld [vmem:[%s1303_s1] sm:$0xff]  ;;  %s287_s13 = scalar_select %p286_p7, %s1175_s12, 6  ;;  %vm319_vm0 = vcmask 130048   ;;  %v879_v7 = vld [vmem:[%s1305_s3 + $0x18] sm:$0xff]  ;;  %v878_v8 = vld [vmem:[%s1305_s3 + $0x10] sm:$0xff]  ;;  %vm387_vm1 = vcmask 523264  }
  0x11   : > { %333 = vmatpush.bf16.msra.mxu0 %v875_v0  ;;  %398 = vmatpush.bf16.msra.mxu1 %v879_v7  ;;  %v877_v9 = vld [vmem:[%s1305_s3 + $0x8] sm:$0xff]  ;;  %v876_v10 = vld [vmem:[%s1305_s3] sm:$0xff]  ;;  %v883_v26 = vld [vmem:[%s1307_s5 + $0x18] sm:$0xff]  ;;  %vm480_vm2 = vcmask 31744   ;;  %s589_s24 = ssub.s32 (%p1167_p4), 7, %s1175_s12  ;;  %s884_s10 = sshll.u32 (%p1167_p4), %s1155_s27, 5 }
  0x12   : > { %s815_s14 = sshll.u32 %s287_s13, 3  ;;  %887 = vmatpush.bf16.msra.mxu3 %v879_v7  ;;  %v979_v12 = vld [vmem:[%s1304_s2] ss:$0 sm:$0xff]  ;;  %465 = vmatpush.bf16.msra.mxu2 %v883_v26  ;;  %v882_v27 = vld [vmem:[%s1307_s5 + $0x10] sm:$0xff]  ;;  %v881_v28 = vld [vmem:[%s1307_s5 + $0x8] sm:$0xff]  ;;  %p590_p8 = scmp.lt.s32.totalorder (%p1167_p4), %s589_s24, 4 }
  0x13   : > { %s289_s17 = scalar_lea.vmem %s1302_s0, %s815_s14  ;;  %v880_v29 = vld [vmem:[%s1307_s5] sm:$0xff]  ;;  %s1253_s14 = scalar_lea.vmem (%p1167_p4), %s1309_s7, %s884_s10  }
  0x14   : > { %v301_v1 = vld [vmem:[%s289_s17] sm:$0xff]  ;;  %v302_v2 = vld [vmem:[%s289_s17 + $0x8] sm:$0xff]  ;;  %v303_v4 = vld [vmem:[%s289_s17 + $0x10] sm:$0xff] }
  0x15   : > { %v305_v3 = vpack.c.bf16 %v302_v2, %v301_v1  ;;  %v304_v5 = vld [vmem:[%s289_s17 + $0x18] sm:$0xff]  ;;  %399 = vmatpush.bf16.msra.mxu1 %v878_v8  ;;  %v980_v31 = vld [vmem:[%s1306_s4] ss:$0 sm:$0xff] }
  0x16   : > { %v306_v6 = vpack.c.bf16 %v304_v5, %v303_v4  ;;  %888 = vmatpush.bf16.msra.mxu3 %v878_v8  ;;  %466 = vmatpush.bf16.msra.mxu2 %v882_v27  ;;  %v981_v45 = vld [vmem:[%s1308_s6] ss:$0 sm:$0xff] }
  0x17   : > { %820 = vmatmul.msk.bf16.vlgmr.msra.gmra.mxu0 %vm319_vm0, %v305_v3 }
  0x19   : > { %400 = vmatpush.bf16.msra.mxu1 %v877_v9 }
  0x1a   : > { %889 = vmatpush.bf16.msra.mxu3 %v877_v9  ;;  %467 = vmatpush.bf16.msra.mxu2 %v881_v28 }
  0x1d   : > { %401 = vmatpush.bf16.msra.mxu1 %v876_v10 }
  0x1e   : > { %890 = vmatpush.bf16.msra.mxu3 %v876_v10  ;;  %468 = vmatpush.bf16.msra.mxu2 %v880_v29 }
  0x27   : > { %821 = vmatmul.msk.bf16.gmra.mxu0 %vm319_vm0, %v306_v6 }
  0x94   : > { %v335_v11 = vpop.f32.mrf.mxu0 }
  0x95   : > { %v336_v13 = vadd.f32 %v979_v12, %v335_v11 }
  0x97   : > { %982 = vtanh.f32 %v336_v13 }
  0x9c   : > { %v337_v14 = vpop.f32.mrf.mxu0 }
  0x9d   : > { %v338_v15 = vadd.f32 %v979_v12, %v337_v14  ;;  %v983_v16 = vpop.eup %982 }
  0x9f   : > { %984 = vtanh.f32 %v338_v15 }
  0xa4   : > { %v340_v17 = vpop.f32.mrf.mxu0 }
  0xa5   : > { %v985_v18 = vpop.eup %984  ;;  %v341_v20 = vadd.f32 %v979_v12, %v340_v17 }
  0xa6   : > { %v349_v19 = vpack.c.bf16 %v985_v18, %v983_v16 }
  0xa7   : > { %986 = vtanh.f32 %v341_v20 }
  0xa8   : > { %838 = vmatmul.msk.bf16.vlgmr.msra.gmra.mxu1 %vm387_vm1, %v349_v19 }
  0xac   : > { %v342_v21 = vpop.f32.mrf.mxu0 }
  0xad   : > { %v343_v22 = vadd.f32 %v979_v12, %v342_v21  ;;  %v987_v23 = vpop.eup %986 }
  0xaf   : > { %988 = vtanh.f32 %v343_v22 }
  0xb5   : > { %v989_v24 = vpop.eup %988 }
  0xb6   : > { %v350_v25 = vpack.c.bf16 %v989_v24, %v987_v23 }
  0xb8   : > { %839 = vmatmul.msk.bf16.vlgmr.msra.gmra.mxu3 %vm387_vm1, %v350_v25 }
 0x125   : > { %v403_v30 = vpop.f32.mrf.mxu1 }
 0x126   : > { %v404_v32 = vadd.f32 %v980_v31, %v403_v30 }
 0x128   : > { %990 = vtanh.f32 %v404_v32 }
 0x12d   : > { %v405_v33 = vpop.f32.mrf.mxu1 }
 0x12e   : > { %v406_v34 = vadd.f32 %v980_v31, %v405_v33  ;;  %v991_v35 = vpop.eup %990 }
 0x130   : > { %992 = vtanh.f32 %v406_v34 }
 0x136   : > { %v993_v36 = vpop.eup %992 }
 0x137   : > { %v417_v37 = vpack.c.bf16 %v993_v36, %v991_v35 }
 0x139   : > { %856 = vmatmul.msk.bf16.vlgmr.msra.gmra.mxu2 %vm387_vm1, %v417_v37 }
 0x13b   : > { %v408_v38 = vpop.f32.mrf.mxu3 }
 0x13c   : > { %v409_v39 = vadd.f32 %v980_v31, %v408_v38 }
 0x13e   : > { %994 = vtanh.f32 %v409_v39 }
 0x143   : > { %v410_v40 = vpop.f32.mrf.mxu3 }
 0x144   : > { %v411_v41 = vadd.f32 %v980_v31, %v410_v40  ;;  %v995_v42 = vpop.eup %994 }
 0x146   : > { %996 = vtanh.f32 %v411_v41 }
 0x14c   : > { %v997_v43 = vpop.eup %996 }
 0x14d   : > { %v418_v44 = vpack.c.bf16 %v997_v43, %v995_v42 }
 0x14f   : > { %857 = vmatmul.msk.bf16.gmra.mxu2 %vm387_vm1, %v418_v44 }
 0x1bc   : > { %v470_v46 = vpop.f32.mrf.mxu2 }
 0x1bd   : > { %v471_v47 = vadd.f32 %v981_v45, %v470_v46 }
 0x1bf   : > { %v481_v48 = vsel %vm480_vm2, %v471_v47, -inf }
 0x1c0   : > { %482 = vmax.xlane.f32.xlu0 %v481_v48 }
 0x1c4   : > { %v472_v49 = vpop.f32.mrf.mxu2 }
 0x1c5   : > { %v473_v50 = vadd.f32 %v981_v45, %v472_v49 }
 0x1c7   : > { %v484_v51 = vsel %vm480_vm2, %v473_v50, -inf }
 0x1c8   : > { %485 = vmax.xlane.f32.xlu0 %v484_v51 }
 0x1d2   : > { %v475_v52 = vpop.f32.mrf.mxu2 }
 0x1d3   : > { %v476_v53 = vadd.f32 %v981_v45, %v475_v52 }
 0x1d5   : > { %v487_v54 = vsel %vm480_vm2, %v476_v53, -inf }
 0x1d6   : > { %488 = vmax.xlane.f32.xlu1 %v487_v54 }
 0x1da   : > { %v477_v55 = vpop.f32.mrf.mxu2 }
 0x1db   : > { %v478_v56 = vadd.f32 %v981_v45, %v477_v55 }
 0x1dd   : > { %v490_v57 = vsel %vm480_vm2, %v478_v56, -inf }
 0x1de   : > { %491 = vmax.xlane.f32.xlu1 %v490_v57 }
 0x233   : > { %v483_v58 = vpop.xlane.xlu0 %482 }
 0x234   : > { %v493_v59 = vsub.f32 %v471_v47, %v483_v58 }
 0x236   : > { %v497_v60 = vmul.f32 1.442695, %v493_v59 }
 0x238   : > { %998 = vpow2.f32 %v497_v60 }
 0x23b   : > { %v486_v61 = vpop.xlane.xlu0 %485 }
 0x23c   : > { %v494_v62 = vsub.f32 %v473_v50, %v486_v61 }
 0x23e   : > { %v999_v63 = vpop.eup %998  ;;  %v499_v0 = vmul.f32 1.442695, %v494_v62 }
 0x23f   : > { %v505_v1 = vsel %vm480_vm2, %v999_v63, 0.0 }
 0x240   : > { %1000 = vpow2.f32 %v499_v0  ;;  %506 = vadd.xlane.f32.xlu2 %v505_v1 }
 0x246   : > { %v1001_v2 = vpop.eup %1000 }
 0x247   : > { %v508_v3 = vsel %vm480_vm2, %v1001_v2, 0.0 }
 0x248   : > { %509 = vadd.xlane.f32.xlu2 %v508_v3 }
 0x249   : > { %v489_v4 = vpop.xlane.xlu1 %488 }
 0x24a   : > { %v495_v5 = vsub.f32 %v476_v53, %v489_v4 }
 0x24c   : > { %v501_v6 = vmul.f32 1.442695, %v495_v5 }
 0x24e   : > { %1002 = vpow2.f32 %v501_v6 }
 0x251   : > { %v492_v7 = vpop.xlane.xlu1 %491 }
 0x252   : > { %v496_v8 = vsub.f32 %v478_v56, %v492_v7 }
 0x254   : > { %v1225_v9 = vpop.eup %1002  ;;  %v503_v10 = vmul.f32 1.442695, %v496_v8 }
 0x255   : > { %v511_v11 = vsel %vm480_vm2, %v1225_v9, 0.0 }
 0x256   : > { %1004 = vpow2.f32 %v503_v10  ;;  %512 = vadd.xlane.f32.xlu0 %v511_v11 }
 0x25c   : > { %v1229_v12 = vpop.eup %1004 }
 0x25d   : > { %v514_v13 = vsel %vm480_vm2, %v1229_v12, 0.0 }
 0x25e   : > { %515 = vadd.xlane.f32.xlu1 %v514_v13 }
 0x2b3   : > { %v507_v14 = vpop.xlane.xlu2 %506 }
 0x2b4   : > { %1006 = vrcp.f32 %v507_v14  ;;  %v528_v19 = vand.u32 2147483648, %v507_v14  ;;  %v526_v21 = vand.u32 2147483647, %v507_v14  ;;  %vm522_vm4 = vweird.f32 %v507_v14 }
 0x2b6   : > { %v529_v24 = vor.u32 1.1754944e-38, %v528_v19  ;;  %vm527_vm6 = vcmp.eq.f32.partialorder %v526_v21, 8.507059e+37 }
 0x2ba   : > { %v1007_v15 = vpop.eup %1006 }
 0x2bb   : > { %v518_v16 = vmul.f32 %v1007_v15, %v507_v14  ;;  %v510_v17 = vpop.xlane.xlu2 %509  ;;  %vm523_vm3 = vweird.f32 %v1007_v15 }
 0x2bc   : > { %1008 = vrcp.f32 %v510_v17  ;;  %vm524_vm5 = vmor %vm522_vm4, %vm523_vm3  ;;  %v543_v30 = vand.u32 2147483648, %v510_v17  ;;  %v541_v32 = vand.u32 2147483647, %v510_v17  ;;  %vm537_vm8 = vweird.f32 %v510_v17 }
 0x2bd   : > { %v519_v18 = vsub.f32 1.0, %v518_v16 }
 0x2be   : > { %v544_v35 = vor.u32 1.1754944e-38, %v543_v30  ;;  %vm542_vm10 = vcmp.eq.f32.partialorder %v541_v32, 8.507059e+37 }
 0x2bf   : > { %v520_v20 = vmul.f32 %v1007_v15, %v519_v18 }
 0x2c1   : > { %v521_v22 = vadd.f32 %v1007_v15, %v520_v20 }
 0x2c2   : > { %v1009_v23 = vpop.eup %1008 }
 0x2c3   : > { %v525_v25 = vsel %vm524_vm5, %v1007_v15, %v521_v22  ;;  %v533_v26 = vmul.f32 %v1009_v23, %v510_v17  ;;  %vm538_vm7 = vweird.f32 %v1009_v23 }
 0x2c4   : > { %v530_v27 = vsel %vm527_vm6, %v529_v24, %v525_v25  ;;  %vm539_vm9 = vmor %vm537_vm8, %vm538_vm7 }
 0x2c5   : > { %v531_v28 = vmul.f32 %v999_v63, %v530_v27  ;;  %v534_v29 = vsub.f32 1.0, %v533_v26 }
 0x2c7   : > { %577 = vst.msk [vmem:[%s1234_s30] sm:$0xff] %vm480_vm2, %v531_v28  ;;  %v535_v31 = vmul.f32 %v1009_v23, %v534_v29 }
 0x2c9   : > { %v536_v33 = vadd.f32 %v1009_v23, %v535_v31  ;;  %v513_v34 = vpop.xlane.xlu0 %512 }
 0x2ca   : > { %1010 = vrcp.f32 %v513_v34  ;;  %v558_v43 = vand.u32 2147483648, %v513_v34  ;;  %v556_v45 = vand.u32 2147483647, %v513_v34  ;;  %vm552_vm12 = vweird.f32 %v513_v34 }
 0x2cb   : > { %v540_v36 = vsel %vm539_vm9, %v1009_v23, %v536_v33 }
 0x2cc   : > { %v545_v37 = vsel %vm542_vm10, %v544_v35, %v540_v36  ;;  %v559_v48 = vor.u32 1.1754944e-38, %v558_v43  ;;  %vm557_vm14 = vcmp.eq.f32.partialorder %v556_v45, 8.507059e+37 }
 0x2cd   : > { %v546_v38 = vmul.f32 %v1001_v2, %v545_v37 }
 0x2cf   : > { %578 = vst.msk [vmem:[%s1234_s30 + $0x8] sm:$0xff] %vm480_vm2, %v546_v38 }
 0x2d0   : > { %v1011_v39 = vpop.eup %1010 }
 0x2d1   : > { %v548_v40 = vmul.f32 %v1011_v39, %v513_v34  ;;  %v516_v41 = vpop.xlane.xlu1 %515  ;;  %vm553_vm11 = vweird.f32 %v1011_v39 }
 0x2d2   : > { %1012 = vrcp.f32 %v516_v41  ;;  %vm554_vm13 = vmor %vm552_vm12, %vm553_vm11  ;;  %v573_v54 = vand.u32 2147483648, %v516_v41  ;;  %v571_v56 = vand.u32 2147483647, %v516_v41  ;;  %vm567_vm0 = vweird.f32 %v516_v41 }
 0x2d3   : > { %v549_v42 = vsub.f32 1.0, %v548_v40 }
 0x2d4   : > { %v574_v58 = vor.u32 1.1754944e-38, %v573_v54  ;;  %vm572_vm3 = vcmp.eq.f32.partialorder %v571_v56, 8.507059e+37 }
 0x2d5   : > { %v550_v44 = vmul.f32 %v1011_v39, %v549_v42 }
 0x2d7   : > { %v551_v46 = vadd.f32 %v1011_v39, %v550_v44 }
 0x2d8   : > { %v1013_v47 = vpop.eup %1012 }
 0x2d9   : > { %v555_v49 = vsel %vm554_vm13, %v1011_v39, %v551_v46  ;;  %v563_v50 = vmul.f32 %v1013_v47, %v516_v41  ;;  %vm568_vm15 = vweird.f32 %v1013_v47 }
 0x2da   : > { %v560_v51 = vsel %vm557_vm14, %v559_v48, %v555_v49  ;;  %vm569_vm1 = vmor %vm567_vm0, %vm568_vm15 }
 0x2db   : > { %v561_v52 = vmul.f32 %v1225_v9, %v560_v51  ;;  %v564_v53 = vsub.f32 1.0, %v563_v50 }
 0x2dd   : > { %579 = vst.msk [vmem:[%s1234_s30 + $0x10] sm:$0xff] %vm480_vm2, %v561_v52  ;;  %v565_v55 = vmul.f32 %v1013_v47, %v564_v53 }
 0x2df   : > { %v566_v57 = vadd.f32 %v1013_v47, %v565_v55 }
 0x2e1   : > { %v570_v59 = vsel %vm569_vm1, %v1013_v47, %v566_v57  ;;  %587 = sbr.rel (!%p1167_p4) target bundleno = 781 (0x30d), region = 52 }
 0x2e2   : > { %v575_v60 = vsel %vm572_vm3, %v574_v58, %v570_v59 }
 0x2e3   : > { %v576_v61 = vmul.f32 %v1229_v12, %v575_v60 }
 0x2e5   : > { %580 = vst.msk [vmem:[%s1234_s30 + $0x18] sm:$0xff] %vm480_vm2, %v576_v61 }
 0x2e6   : > { %s1318_s24 = smov (!%p590_p8, %s589_s24), 4 }
 0x2e7   : > { %s860_s15 = sshll.u32 %s1318_s24, 3 }
 0x2e8   : > { %p863_p9 = scmp.eq.s32.totalorder %s860_s15, 0 }
 0x2e9   : > { %s1259_s16 = sshrl.u32 (!%p863_p9), %s1318_s24, 2 }
 0x2ea   : > { %598 = sbr.rel (%p863_p9) target bundleno = 781 (0x30d), region = 56  ;;  %p864_p10 = scmp.le.s32.totalorder (!%p863_p9), %s1259_s16, 0 }
 0x2ef   : > { %765 = sbr.rel (%p864_p10) target bundleno = 764 (0x2fc), region = 132  ;;  %s1311_s27 = smov (!%p864_p10), %s1253_s14 }
 0x2f0   : > { %s1312_s9 = smov (!%p864_p10), %s1234_s30  ;;  %s1268_s12 = smov (!%p864_p10), 0  }
 0x2f1   : > { %s1082_s17 = smov (!%p864_p10), 0  }
 0x2f4 LB: >> { %v667_v62 = vld [vmem:[%s1076_s9] sm:$0xff]  ;;  %v669_v63 = vld [vmem:[%s1076_s9 + $0x8] sm:$0xff]  ;;  %v671_v0 = vld [vmem:[%s1076_s9 + $0x10] sm:$0xff]  ;;  %s675_s18 = sadd.s32 1, %s1080_s12  ;;  %s661_s17 = sadd.s32 1, %s1084_s17   ;;  %s1084_s17 = sphi %s1082_s17, %s661_s17   ;;  %s1080_s12 = sphi %s1268_s12, %s1313_s12   ;;  %s1076_s9 = sphi %s1312_s9, %s680_s9   ;;  %s1072_s27 = sphi %s1311_s27, %s681_s27  }
 0x2f5   : >> { %668 = vst [vmem:[%s1072_s27] sm:$0xff] %v667_v62  ;;  %v673_v1 = vld [vmem:[%s1076_s9 + $0x18] sm:$0xff]  ;;  %p676_p11 = scmp.ge.s32.totalorder %s675_s18, %s1259_s16  ;;  %p660_p12 = scmp.ge.s32.totalorder %s661_s17, %s1259_s16 }
 0x2f6   : >> { %670 = vst [vmem:[%s1072_s27 + $0x8] sm:$0xff] %v669_v63 }
 0x2f7   : >> { %672 = vst [vmem:[%s1072_s27 + $0x10] sm:$0xff] %v671_v0  ;;  %s1320_s18 = smov (%p676_p11, %s675_s18), 0  ;;  %663 = sbr.rel (!%p660_p12) target bundleno = 756 (0x2f4), region = 138 }
 0x2f8   : >> { %674 = vst [vmem:[%s1072_s27 + $0x18] sm:$0xff] %v673_v1  ;;  %s865_s19 = sshll.u32 %s1320_s18, 5  ;;  %s1313_s12 = smov %s1320_s18 }
 0x2f9   : >> { %s680_s9 = scalar_lea.vmem %s1234_s30, %s865_s19 [#allocation2]   ;;  %s681_s27 = scalar_lea.vmem %s1253_s14, %s865_s19  }
 0x2fc PF: > { %s1284_s20 = sand.u32 3, %s1318_s24   ;;  %s885_s21 = sshll.u32 %s1259_s16, 5 }
 0x2fd   : > { %s686_s22 = scalar_lea.vmem %s1234_s30, %s885_s21 [#allocation2]   ;;  %s688_s23 = scalar_lea.vmem %s1253_s14, %s885_s21  }
 0x2fe   : > { %p870_p13 = scmp.le.s32.totalorder %s1284_s20, 0 }
 0x2ff   : > { %s1086_s26 = smov (!%p870_p13), %s688_s23   ;;  %s1090_s29 = smov (!%p870_p13), %s686_s22  }
 0x300   : > { %779 = sbr.rel (%p870_p13) target bundleno = 781 (0x30d), region = 143  ;;  %s1094_s10 = smov (!%p870_p13), 0  }
 0x301   : > { %s1098_s11 = smov (!%p870_p13), 0  }
 0x305 LB: >> { %v698_v2 = vld [vmem:[%s1092_s29] sm:$0xff]  ;;  %s700_s24 = sadd.s32 1, %s1096_s10  ;;  %s692_s11 = sadd.s32 1, %s1100_s11   ;;  %s1100_s11 = sphi %s1098_s11, %s692_s11   ;;  %s1096_s10 = sphi %s1094_s10, %s1095_s10   ;;  %s1092_s29 = sphi %s1090_s29, %s705_s29   ;;  %s1088_s26 = sphi %s1086_s26, %s706_s26  }
 0x306   : >> { %699 = vst [vmem:[%s1088_s26] sm:$0xff] %v698_v2  ;;  %p701_p0 = scmp.ge.s32.totalorder %s700_s24, %s1284_s20  ;;  %p691_p1 = scmp.ge.s32.totalorder %s692_s11, %s1284_s20 }
 0x308   : >> { %s1322_s24 = smov (%p701_p0, %s700_s24), 0  ;;  %694 = sbr.rel (!%p691_p1) target bundleno = 773 (0x305), region = 149 }
 0x309   : >> { %s871_s30 = sshll.u32 %s1322_s24, 3  ;;  %s1095_s10 = smov %s1322_s24  }
 0x30a   : >> { %s705_s29 = scalar_lea.vmem %s686_s22, %s871_s30 [#allocation2]   ;;  %s706_s26 = scalar_lea.vmem %s688_s23, %s871_s30  }
 0x30d PF: > { %p14_p2 = scmp.ge.s32.totalorder %s1157_s28, 4   ;;  %s1314_s24 = smov %s1064_s25 }
 0x30e   : > { %s1315_s25 = smov %s1165_s8  ;;  %s1316_s26 = smov %s1157_s28 }
 0x30f   :  { %16 = sbr.rel (!%p14_p2) target bundleno = 2 (0x2), region = 160 }

</bundles_post_ra>
